<compile_context>
chip_gen: v7x
topology: tpu7x:2x2x1
jax: 0.10.0
libtpu: 0.0.40
codegen_flags: <defaults>
</compile_context>

<pallas_src>
import functools

import jax
import jax.numpy as jnp
from jax.experimental import pallas as pl
from jax.experimental.pallas import tpu as pltpu


IN_FEATURES = 28 * 28   # 784 — multiple of 8; full-extent last dim satisfies (8,128)
HIDDEN = 128
N_CLASSES = 10
OUT_PAD = 128           # lane-dense logits / output width
NEG_BIG = -1e30         # Python float literal (NOT a traced jnp constant)


def _round_up(n, m):
    return ((n + m - 1) // m) * m


def mnist_kernel(x_ref, w1_ref, b1_ref, w2_ref, b2_ref, o_ref):
    # x_ref : (TB, 784) f32      w1_ref: (784, 128) bf16   b1_ref: (1, 128) f32
    # w2_ref: (128, 128) bf16    b2_ref: (1, 128)  f32     o_ref : (TB, 128) bf16
    x = x_ref[...].astype(jnp.bfloat16)   # in-kernel VPU cast (no wrapper prep pass)

    # fc1 + ReLU (bf16 MXU operands, f32 accumulate; elementwise stays f32)
    h = jnp.dot(x, w1_ref[...], preferred_element_type=jnp.float32) + b1_ref[...]
    h = jnp.maximum(h, 0.0)

    # fc2 (lane-dense 128-wide logits; padded weight columns are zero)
    logits = jnp.dot(h.astype(jnp.bfloat16), w2_ref[...],
                     preferred_element_type=jnp.float32) + b2_ref[...]

    # mask the 118 padded class columns so they don't affect max / sum-exp
    col = jax.lax.broadcasted_iota(jnp.int32, logits.shape, 1)
    logits = jnp.where(col < N_CLASSES, logits, NEG_BIG)

    # numerically stable log_softmax over the class dim (f32)
    m = jnp.max(logits, axis=1, keepdims=True)
    shifted = logits - m
    # Note: if XLU reductions ever bind on v7x, this sum can be moved onto the
    # (mostly idle) MXU via a dot with a ones matrix.
    lse = jnp.log(jnp.sum(jnp.exp(shifted), axis=1, keepdims=True))
    o_ref[...] = (shifted - lse).astype(o_ref.dtype)


@functools.partial(jax.jit, static_argnames=("block_b",))
def mnist_net_pallas(x, w1, b1, w2, b2, *, block_b=4096):
    """x: (..., 1, 28, 28) or (..., 784). Returns (B, 10) log-probabilities (f32)."""
    x2d = x.reshape(-1, IN_FEATURES)
    if x2d.dtype != jnp.float32:
        x2d = x2d.astype(jnp.float32)
    B = x2d.shape[0]

    # Pad the batch only to a sublane multiple (8); pl.cdiv + Pallas masking handle
    # a partial final tile, so no round-up-to-tile blow-up for unlucky batch sizes.
    B8 = _round_up(B, 8)
    if B8 != B:
        x2d = jnp.pad(x2d, ((0, B8 - B), (0, 0)))

    tb = min(_round_up(max(block_b, 8), 8), B8)   # guard: tile is a multiple of 8
    grid = (pl.cdiv(B8, tb),)

    # Small one-time weight prep (bf16 MXU operands, zero-padded class columns).
    w1_b = w1.astype(jnp.bfloat16)                                          # (784, 128)
    b1_r = b1.reshape(1, HIDDEN).astype(jnp.float32)                        # (1, 128)
    w2_b = jnp.pad(w2.astype(jnp.float32),
                   ((0, 0), (0, OUT_PAD - N_CLASSES))).astype(jnp.bfloat16)  # (128, 128)
    b2_r = jnp.pad(b2.reshape(1, N_CLASSES).astype(jnp.float32),
                   ((0, 0), (0, OUT_PAD - N_CLASSES)))                       # (1, 128)

    out = pl.pallas_call(
        mnist_kernel,
        out_shape=jax.ShapeDtypeStruct((B8, OUT_PAD), jnp.bfloat16),
        grid_spec=pltpu.PrefetchScalarGridSpec(
            num_scalar_prefetch=0,
            grid=grid,
            in_specs=[
                pl.BlockSpec((tb, IN_FEATURES), lambda i: (i, 0)),       # x: streamed
                pl.BlockSpec((IN_FEATURES, HIDDEN), lambda i: (0, 0)),   # w1: resident
                pl.BlockSpec((1, HIDDEN), lambda i: (0, 0)),             # b1: resident
                pl.BlockSpec((HIDDEN, OUT_PAD), lambda i: (0, 0)),       # w2: resident
                pl.BlockSpec((1, OUT_PAD), lambda i: (0, 0)),            # b2: resident
            ],
            out_specs=pl.BlockSpec((tb, OUT_PAD), lambda i: (i, 0)),
        ),
        compiler_params=pltpu.CompilerParams(
            dimension_semantics=("parallel",),   # megacore-shard the batch on v7x
            vmem_limit_bytes=48 << 20,           # v7x-safe; v5e/v6e could go higher
        ),
    )(x2d, w1_b, b1_r, w2_b, b2_r)

    # Downstream consumers (NLL / argmax) could read the padded (B8, 128) bf16
    # output directly and skip this slice pass; kept here to match the module API.
    return out[:B, :N_CLASSES].astype(jnp.float32)


def init_params(key):
    """Deterministic parameter init mimicking nn.Linear shapes.

    fc1: weight (128, 784), bias (128)  -> stored as w1 (784, 128), b1 (1, 128)
    fc2: weight (10, 128),  bias (10)   -> stored as w2 (128, 10),  b2 (1, 10)
    """
    k1, k2, k3, k4 = jax.random.split(key, 4)
    s1 = 1.0 / jnp.sqrt(784.0)
    s2 = 1.0 / jnp.sqrt(128.0)
    w1 = jax.random.uniform(k1, (IN_FEATURES, HIDDEN), jnp.float32, -s1, s1)
    b1 = jax.random.uniform(k2, (1, HIDDEN), jnp.float32, -s1, s1)
    w2 = jax.random.uniform(k3, (HIDDEN, N_CLASSES), jnp.float32, -s2, s2)
    b2 = jax.random.uniform(k4, (1, N_CLASSES), jnp.float32, -s2, s2)
    return w1, b1, w2, b2


if __name__ == "__main__":
    key = jax.random.PRNGKey(0)
    kx, kp = jax.random.split(key)

    # Small MNIST-like batch: (B, 1, 28, 28) NCHW
    B = 8
    x = jax.random.normal(kx, (B, 1, 28, 28), jnp.float32)
    w1, b1, w2, b2 = init_params(kp)

    out = mnist_net_pallas(x, w1, b1, w2, b2)
    out = jax.block_until_ready(out)

    # Reference check in plain JAX (f32 math); tolerance accounts for bf16 MXU
    # operands and bf16 output storage.
    xr = x.reshape(-1, IN_FEATURES)
    h = jnp.maximum(xr @ w1 + b1, 0.0)
    logits = h @ w2 + b2
    ref = jax.nn.log_softmax(logits, axis=1)

    assert out.shape == (B, N_CLASSES)
    max_err = jnp.max(jnp.abs(out - ref))
    assert jnp.allclose(out, ref, atol=5e-2, rtol=5e-2), f"max abs err {max_err}"
    # log-probabilities must (approximately) normalize to 1 per row
    assert jnp.allclose(jnp.sum(jnp.exp(out), axis=1), 1.0, atol=2e-2)

    print("KERNEL_OK")
</pallas_src>

<mosaic_0001>
module attributes {stable_mosaic.version = 11 : i64} {
  func.func @mnist_kernel(%arg0: i32, %arg1: memref<8x784xf32, #tpu.memory_space<vmem>>, %arg2: memref<784x128xbf16, #tpu.memory_space<vmem>>, %arg3: memref<1x128xf32, #tpu.memory_space<vmem>>, %arg4: memref<128x128xbf16, #tpu.memory_space<vmem>>, %arg5: memref<1x128xf32, #tpu.memory_space<vmem>>, %arg6: memref<8x128xbf16, #tpu.memory_space<vmem>>) attributes {dimension_semantics = [#tpu.dimension_semantics<parallel>], iteration_bounds = array<i64: 1>, scalar_prefetch = 0 : i64, scratch_operands = 0 : i64, tpu.core_type = #tpu.core_type<tc>, window_params = [{transform_indices = @transform_0, window_bounds = array<i64: 8, 784>}, {pipeline_mode = #tpu.pipeline_mode<synchronous>, transform_indices = @transform_1, window_bounds = array<i64: 784, 128>}, {pipeline_mode = #tpu.pipeline_mode<synchronous>, transform_indices = @transform_2, window_bounds = array<i64: 1, 128>}, {pipeline_mode = #tpu.pipeline_mode<synchronous>, transform_indices = @transform_3, window_bounds = array<i64: 128, 128>}, {pipeline_mode = #tpu.pipeline_mode<synchronous>, transform_indices = @transform_4, window_bounds = array<i64: 1, 128>}, {transform_indices = @transform_5, window_bounds = array<i64: 8, 128>}]} {
    %c0 = arith.constant 0 : index
    %c0_0 = arith.constant 0 : index
    %0 = vector.load %arg1[%c0, %c0_0] : memref<8x784xf32, #tpu.memory_space<vmem>>, vector<8x784xf32>
    %1 = arith.truncf %0 : vector<8x784xf32> to vector<8x784xbf16>
    %c0_1 = arith.constant 0 : index
    %c0_2 = arith.constant 0 : index
    %2 = vector.load %arg2[%c0_1, %c0_2] : memref<784x128xbf16, #tpu.memory_space<vmem>>, vector<784x128xbf16>
    %cst = arith.constant dense<0.000000e+00> : vector<8x128xf32>
    %3 = tpu.matmul %1, %2, %cst {dimension_numbers = #tpu.dot_dimension_numbers<[1], [0], [0], [1], [0, 0, 1, 1], [], []>} : vector<8x784xbf16>, vector<784x128xbf16>, vector<8x128xf32> -> vector<8x128xf32>
    %c0_3 = arith.constant 0 : index
    %c0_4 = arith.constant 0 : index
    %4 = vector.load %arg3[%c0_3, %c0_4] : memref<1x128xf32, #tpu.memory_space<vmem>>, vector<1x128xf32>
    %5 = vector.broadcast %4 : vector<1x128xf32> to vector<8x128xf32>
    %6 = arith.addf %3, %5 : vector<8x128xf32>
    %cst_5 = arith.constant 0.000000e+00 : f32
    %7 = vector.broadcast %cst_5 : f32 to vector<8x128xf32>
    %8 = arith.maximumf %6, %7 : vector<8x128xf32>
    %9 = arith.truncf %8 : vector<8x128xf32> to vector<8x128xbf16>
    %c0_6 = arith.constant 0 : index
    %c0_7 = arith.constant 0 : index
    %10 = vector.load %arg4[%c0_6, %c0_7] : memref<128x128xbf16, #tpu.memory_space<vmem>>, vector<128x128xbf16>
    %cst_8 = arith.constant dense<0.000000e+00> : vector<8x128xf32>
    %11 = tpu.matmul %9, %10, %cst_8 {dimension_numbers = #tpu.dot_dimension_numbers<[1], [0], [0], [1], [0, 0, 1, 1], [], []>} : vector<8x128xbf16>, vector<128x128xbf16>, vector<8x128xf32> -> vector<8x128xf32>
    %c0_9 = arith.constant 0 : index
    %c0_10 = arith.constant 0 : index
    %12 = vector.load %arg5[%c0_9, %c0_10] : memref<1x128xf32, #tpu.memory_space<vmem>>, vector<1x128xf32>
    %13 = vector.broadcast %12 : vector<1x128xf32> to vector<8x128xf32>
    %14 = arith.addf %11, %13 : vector<8x128xf32>
    %15 = tpu.iota {dimensions = array<i32: 1>} : vector<8x128xi32>
    %c10_i32 = arith.constant 10 : i32
    %16 = vector.broadcast %c10_i32 : i32 to vector<8x128xi32>
    %17 = arith.cmpi slt, %15, %16 : vector<8x128xi32>
    %cst_11 = arith.constant -1.000000e+30 : f32
    %18 = vector.broadcast %cst_11 : f32 to vector<8x128xf32>
    %19 = arith.select %17, %14, %18 : vector<8x128xi1>, vector<8x128xf32>
    %cst_12 = arith.constant dense<0xFF800000> : vector<8xf32>
    %20 = vector.multi_reduction <maximumf>, %19, %cst_12 [1] : vector<8x128xf32> to vector<8xf32>
    %21 = vector.shape_cast %20 : vector<8xf32> to vector<8x1xf32>
    %22 = vector.broadcast %21 : vector<8x1xf32> to vector<8x128xf32>
    %23 = arith.subf %19, %22 : vector<8x128xf32>
    %24 = math.exp %23 : vector<8x128xf32>
    %cst_13 = arith.constant dense<0.000000e+00> : vector<8xf32>
    %25 = vector.multi_reduction <add>, %24, %cst_13 [1] : vector<8x128xf32> to vector<8xf32>
    %26 = vector.shape_cast %25 : vector<8xf32> to vector<8x1xf32>
    %27 = math.log %26 : vector<8x1xf32>
    %28 = vector.broadcast %27 : vector<8x1xf32> to vector<8x128xf32>
    %29 = arith.subf %23, %28 : vector<8x128xf32>
    %30 = arith.truncf %29 : vector<8x128xf32> to vector<8x128xbf16>
    %c0_14 = arith.constant 0 : index
    %c0_15 = arith.constant 0 : index
    %31 = vector.load %arg6[%c0_14, %c0_15] : memref<8x128xbf16, #tpu.memory_space<vmem>>, vector<8x128xbf16>
    tpu.vector_store %arg6[%c0_14, %c0_15], %30 {strides = array<i32>} : memref<8x128xbf16, #tpu.memory_space<vmem>>, vector<8x128xbf16>,
    return
  }
  func.func @transform_0(%arg0: i32) -> (i32, i32) {
    %c0_i32 = arith.constant 0 : i32
    %c0_i32_0 = arith.constant 0 : i32
    return %arg0, %c0_i32 : i32, i32
  }
  func.func @transform_1(%arg0: i32) -> (i32, i32) {
    %c0_i32 = arith.constant 0 : i32
    %c0_i32_0 = arith.constant 0 : i32
    %c0_i32_1 = arith.constant 0 : i32
    return %c0_i32, %c0_i32_0 : i32, i32
  }
  func.func @transform_2(%arg0: i32) -> (i32, i32) {
    %c0_i32 = arith.constant 0 : i32
    %c0_i32_0 = arith.constant 0 : i32
    %c0_i32_1 = arith.constant 0 : i32
    return %c0_i32, %c0_i32_0 : i32, i32
  }
  func.func @transform_3(%arg0: i32) -> (i32, i32) {
    %c0_i32 = arith.constant 0 : i32
    %c0_i32_0 = arith.constant 0 : i32
    %c0_i32_1 = arith.constant 0 : i32
    return %c0_i32, %c0_i32_0 : i32, i32
  }
  func.func @transform_4(%arg0: i32) -> (i32, i32) {
    %c0_i32 = arith.constant 0 : i32
    %c0_i32_0 = arith.constant 0 : i32
    %c0_i32_1 = arith.constant 0 : i32
    return %c0_i32, %c0_i32_0 : i32, i32
  }
  func.func @transform_5(%arg0: i32) -> (i32, i32) {
    %c0_i32 = arith.constant 0 : i32
    %c0_i32_0 = arith.constant 0 : i32
    return %arg0, %c0_i32 : i32, i32
  }
}

</mosaic_0001>

<bundles_post_ra>
// kernel: mnist_net_pallas.1
= control target key start
LH: loop header
LB: loop body
LE: loop exit
PB: predicated region body
PF: predicated region fallthrough
CT: control target
= control target key end

     0   :  { %v957_v44 = vmov 0.0   ;;  %vm958_vm0 = vmmov 0   ;;  %vm434_vm1 = vcmask 130048   ;;  %s1203_s1 = inlined_call_operand.vmem [shape: bf16[784,128], index: 1, kind: input, shape index: {}]   ;;  %s1204_s0 = inlined_call_operand.vmem [shape: f32[8,784], index: 0, kind: input, shape index: {}]   ;;  %s1205_s3 = inlined_call_operand.vmem [shape: bf16[128,128], index: 3, kind: input, shape index: {}]   ;;  %s1206_s2 = inlined_call_operand.vmem [shape: f32[1,128], index: 2, kind: input, shape index: {}]   ;;  %s1207_s4 = inlined_call_operand.vmem [shape: f32[1,128], index: 4, kind: input, shape index: {}]   ;;  %s1208_s5 = inlined_call_operand.vmem [shape: bf16[8,128], index: 5, kind: output, shape index: {}]  }
   0x1   :  { %v896_v0 = vld [vmem:[%s1203_s1 + $0x40] sm:$0xff]   ;;  %v900_v4 = vld [vmem:[%s1203_s1 + $0x48] sm:$0xff]   ;;  %v904_v8 = vld [vmem:[%s1203_s1 + $0x50] sm:$0xff]  }
   0x2   :  { %v897_v1 = vld [vmem:[%s1203_s1] sm:$0xff]   ;;  %791 = vmatprep.subr.bf16.mxu0 %v896_v0  ;;  %v901_v5 = vld [vmem:[%s1203_s1 + $0x8] sm:$0xff]   ;;  %v905_v9 = vld [vmem:[%s1203_s1 + $0x10] sm:$0xff]  }
   0x3   :  { %v898_v2 = vld [vmem:[%s1203_s1 + $0xc0] sm:$0xff]   ;;  %792 = vmatpush3.bf16.msra.mxu0 %v897_v1  ;;  %v902_v6 = vld [vmem:[%s1203_s1 + $0xc8] sm:$0xff]   ;;  %v906_v10 = vld [vmem:[%s1203_s1 + $0xd0] sm:$0xff]  }
   0x4   :  { %v899_v3 = vld [vmem:[%s1203_s1 + $0x80] sm:$0xff]   ;;  %813 = vmatprep.subr.bf16.mxu1 %v898_v2  ;;  %793 = vmatprep.subr.bf16.mxu0 %v900_v4  ;;  %v903_v7 = vld [vmem:[%s1203_s1 + $0x88] sm:$0xff]   ;;  %v907_v11 = vld [vmem:[%s1203_s1 + $0x90] sm:$0xff]  }
   0x5   :  { %814 = vmatpush3.bf16.msra.mxu1 %v899_v3  ;;  %v908_v12 = vld [vmem:[%s1203_s1 + $0x58] sm:$0xff]   ;;  %v912_v16 = vld [vmem:[%s1203_s1 + $0x60] sm:$0xff]   ;;  %v916_v20 = vld [vmem:[%s1203_s1 + $0x68] sm:$0xff]  }
   0x6   :  { %815 = vmatprep.subr.bf16.mxu1 %v902_v6  ;;  %v909_v13 = vld [vmem:[%s1203_s1 + $0x18] sm:$0xff]   ;;  %v913_v17 = vld [vmem:[%s1203_s1 + $0x20] sm:$0xff]   ;;  %v917_v21 = vld [vmem:[%s1203_s1 + $0x28] sm:$0xff]  }
   0x7   :  { %794 = vmatpush3.bf16.msra.mxu0 %v901_v5  ;;  %v910_v14 = vld [vmem:[%s1203_s1 + $0xd8] sm:$0xff]   ;;  %v914_v18 = vld [vmem:[%s1203_s1 + $0xe0] sm:$0xff]   ;;  %v918_v22 = vld [vmem:[%s1203_s1 + $0xe8] sm:$0xff]  }
   0x8   :  { %795 = vmatprep.subr.bf16.mxu0 %v904_v8  ;;  %v911_v15 = vld [vmem:[%s1203_s1 + $0x98] sm:$0xff]   ;;  %v915_v19 = vld [vmem:[%s1203_s1 + $0xa0] sm:$0xff]   ;;  %v919_v23 = vld [vmem:[%s1203_s1 + $0xa8] sm:$0xff]  }
   0x9   :  { %816 = vmatpush3.bf16.msra.mxu1 %v903_v7  ;;  %v920_v24 = vld [vmem:[%s1203_s1 + $0x70] sm:$0xff]   ;;  %v924_v28 = vld [vmem:[%s1203_s1 + $0x78] sm:$0xff]   ;;  %v22_v31 = vld [vmem:[%s1204_s0 + $0x8] sm:$0xff] }
   0xa   :  { %817 = vmatprep.subr.bf16.mxu1 %v906_v10  ;;  %v921_v25 = vld [vmem:[%s1203_s1 + $0x30] sm:$0xff]   ;;  %v925_v29 = vld [vmem:[%s1203_s1 + $0x38] sm:$0xff]   ;;  %v29_v32 = vpack.c.bf16 %v22_v31, %v22_v31  ;;  %v21_v34 = vld [vmem:[%s1204_s0] sm:$0xff] }
   0xb   :  { %796 = vmatpush3.bf16.msra.mxu0 %v905_v9  ;;  %v922_v26 = vld [vmem:[%s1203_s1 + $0xf0] sm:$0xff]   ;;  %v926_v30 = vld [vmem:[%s1203_s1 + $0xf8] sm:$0xff]   ;;  %v28_v35 = vpack.c.bf16 %v21_v34, %v21_v34  ;;  %v928_v36 = vld [vmem:[%s1203_s1 + $0x140] sm:$0xff]   ;;  %v711_v34 = vlaneseq }
   0xc   :  { %797 = vmatprep.subr.bf16.mxu0 %v908_v12  ;;  %v923_v27 = vld [vmem:[%s1203_s1 + $0xb0] sm:$0xff]   ;;  %v927_v33 = vld [vmem:[%s1203_s1 + $0xb8] sm:$0xff]   ;;  %470 = vmatprep.mubr.bf16.mxu0 %v29_v32  ;;  %v929_v39 = vld [vmem:[%s1203_s1 + $0x100] sm:$0xff]  }
   0xd   :  { %818 = vmatpush3.bf16.msra.mxu1 %v907_v11  ;;  %v24_v37 = vld [vmem:[%s1204_s0 + $0x18] sm:$0xff]  ;;  %v23_v40 = vld [vmem:[%s1204_s0 + $0x10] sm:$0xff]  ;;  %v930_v42 = vld [vmem:[%s1203_s1 + $0x148] sm:$0xff]  }
   0xe   :  { %819 = vmatprep.subr.bf16.mxu1 %v910_v14  ;;  %v31_v38 = vpack.c.bf16 %v24_v37, %v24_v37  ;;  %v30_v41 = vpack.c.bf16 %v23_v40, %v23_v40  ;;  %v931_v43 = vld [vmem:[%s1203_s1 + $0x108] sm:$0xff]   ;;  %v932_v45 = vld [vmem:[%s1203_s1 + $0x150] sm:$0xff]   ;;  %v934_v47 = vld [vmem:[%s1203_s1 + $0x158] sm:$0xff]  }
   0xf   :  { %798 = vmatpush3.bf16.msra.mxu0 %v909_v13  ;;  %v933_v46 = vld [vmem:[%s1203_s1 + $0x110] sm:$0xff]   ;;  %v935_v48 = vld [vmem:[%s1203_s1 + $0x118] sm:$0xff]   ;;  %v936_v49 = vld [vmem:[%s1203_s1 + $0x160] sm:$0xff]  }
  0x10   :  { %799 = vmatprep.subr.bf16.mxu0 %v912_v16  ;;  %510 = vmatprep.mubr.bf16.mxu1 %v31_v38  ;;  %v937_v50 = vld [vmem:[%s1203_s1 + $0x120] sm:$0xff]   ;;  %v938_v51 = vld [vmem:[%s1203_s1 + $0x168] sm:$0xff]   ;;  %v27_v55 = vld [vmem:[%s1204_s0 + $0x30] sm:$0xff] }
  0x11   :  { %820 = vmatpush3.bf16.msra.mxu1 %v911_v15  ;;  %v944_v52 = vld [vmem:[%s1203_s1 + $0x180] sm:$0xff]   ;;  %v26_v53 = vld [vmem:[%s1204_s0 + $0x28] sm:$0xff]  ;;  %v34_v57 = vpack.c.bf16 %v27_v55, %v27_v55  ;;  %v940_v58 = vld [vmem:[%s1203_s1 + $0x170] sm:$0xff]  }
  0x12   :  { %821 = vmatprep.subr.bf16.mxu1 %v914_v18  ;;  %v33_v54 = vpack.c.bf16 %v26_v53, %v26_v53  ;;  %v939_v56 = vld [vmem:[%s1203_s1 + $0x128] sm:$0xff]   ;;  %v941_v59 = vld [vmem:[%s1203_s1 + $0x130] sm:$0xff]   ;;  %v942_v60 = vld [vmem:[%s1203_s1 + $0x178] sm:$0xff]  }
  0x13   :  { %800 = vmatpush3.bf16.msra.mxu0 %v913_v17  ;;  %v943_v61 = vld [vmem:[%s1203_s1 + $0x138] sm:$0xff]   ;;  %v25_v62 = vld [vmem:[%s1204_s0 + $0x20] sm:$0xff]  ;;  %v946_v1 = vld [vmem:[%s1205_s3 + $0x8] sm:$0xff]  }
  0x14   :  { %801 = vmatprep.subr.bf16.mxu0 %v916_v20  ;;  %v32_v63 = vpack.c.bf16 %v25_v62, %v25_v62  ;;  %v945_v0 = vld [vmem:[%s1205_s3] sm:$0xff]   ;;  %v947_v2 = vld [vmem:[%s1205_s3 + $0x10] sm:$0xff]   ;;  %v948_v3 = vld [vmem:[%s1205_s3 + $0x18] sm:$0xff]  }
  0x15   :  { %822 = vmatpush3.bf16.msra.mxu1 %v915_v19  ;;  %v949_v4 = vld [vmem:[%s1205_s3 + $0x20] sm:$0xff]   ;;  %v950_v5 = vld [vmem:[%s1205_s3 + $0x28] sm:$0xff]   ;;  %v951_v6 = vld [vmem:[%s1205_s3 + $0x30] sm:$0xff]  }
  0x16   :  { %823 = vmatprep.subr.bf16.mxu1 %v918_v22  ;;  %v952_v7 = vld [vmem:[%s1205_s3 + $0x38] sm:$0xff]   ;;  %v731_v9 = vld [vmem:[%s1206_s2] ss:$0 sm:$0xff] }
  0x17   :  { %802 = vmatpush3.bf16.msra.mxu0 %v917_v21 }
  0x18   :  { %803 = vmatprep.subr.bf16.mxu0 %v920_v24 }
  0x19   :  { %824 = vmatpush3.bf16.msra.mxu1 %v919_v23 }
  0x1a   :  { %825 = vmatprep.subr.bf16.mxu1 %v922_v26 }
  0x1b   :  { %804 = vmatpush3.bf16.msra.mxu0 %v921_v25 }
  0x1c   :  { %805 = vmatprep.subr.bf16.mxu0 %v924_v28 }
  0x1d   :  { %826 = vmatpush3.bf16.msra.mxu1 %v923_v27 }
  0x1e   :  { %827 = vmatprep.subr.bf16.mxu1 %v926_v30 }
  0x1f   :  { %806 = vmatpush3.bf16.msra.mxu0 %v925_v29 }
  0x20   :  { %835 = vmatprep.subr.bf16.mxu0 %v928_v36  ;;  %v782_v36 = vld [vmem:[%s1207_s4] ss:$0 sm:$0xff] }
  0x21   :  { %828 = vmatpush3.bf16.msra.mxu1 %v927_v33 }
  0x22   :  { %471 = vmatmul.mubr.bf16.vlgmr.msra.gmra.mrb[0].mxu0 %v28_v35  ;;  %868 = vmatprep.subr.bf16.mxu1 %v957_v44  ;;  %v712_v35 = vand.u32 127, %v711_v34 }
  0x23   :  { %836 = vmatpush3.bf16.msra.mxu0 %v929_v39  ;;  %550 = vmatprep.mubr.bf16.mxu0 %v33_v54 }
  0x24   :  { %511 = vmatmul.mubr.bf16.vlgmr.msra.gmra.mrb[0].mxu1 %v30_v41  ;;  %837 = vmatprep.subr.bf16.mxu0 %v930_v42  ;;  %vm713_vm2 = vcmp.lt.s32.totalorder %v712_v35, 10 }
  0x25   :  { %870 = vmatprep.mubr.msk.bf16.mxu1 %vm958_vm0, %v957_v44  ;;  %869 = vmatpush3.bf16.msra.mxu1 %v944_v52 }
  0x26   :  { %874 = vmatprep.subr.bf16.mxu1 %v957_v44 }
  0x27   :  { %838 = vmatpush3.bf16.msra.mxu0 %v931_v43 }
  0x28   :  { %839 = vmatprep.subr.bf16.mxu0 %v932_v45 }
  0x2b   :  { %840 = vmatpush3.bf16.msra.mxu0 %v933_v46 }
  0x2c   :  { %841 = vmatprep.subr.bf16.mxu0 %v934_v47  ;;  %871 = vmatmul.mubr.msk.bf16.vlgmr.msra.gmra.mrb[4].mxu1 %vm434_vm1, %v34_v57 }
  0x2d   :  { %890 = vmatprep.mubr.msk.bf16.mxu1 %vm958_vm0, %v957_v44  ;;  %875 = vmatpush3.bf16.msra.mxu1 %v945_v0 }
  0x2e   :  { %876 = vmatprep.subr.bf16.mxu1 %v957_v44 }
  0x2f   :  { %842 = vmatpush3.bf16.msra.mxu0 %v935_v48 }
  0x30   :  { %843 = vmatprep.subr.bf16.mxu0 %v936_v49 }
  0x31   :  { %877 = vmatpush3.bf16.msra.mxu1 %v946_v1 }
  0x32   :  { %878 = vmatprep.subr.bf16.mxu1 %v957_v44 }
  0x33   :  { %844 = vmatpush3.bf16.msra.mxu0 %v937_v50 }
  0x34   :  { %845 = vmatprep.subr.bf16.mxu0 %v938_v51 }
  0x35   :  { %879 = vmatpush3.bf16.msra.mxu1 %v947_v2 }
  0x36   :  { %880 = vmatprep.subr.bf16.mxu1 %v957_v44 }
  0x37   :  { %846 = vmatpush3.bf16.msra.mxu0 %v939_v56 }
  0x38   :  { %847 = vmatprep.subr.bf16.mxu0 %v940_v58 }
  0x39   :  { %881 = vmatpush3.bf16.msra.mxu1 %v948_v3 }
  0x3a   :  { %882 = vmatprep.subr.bf16.mxu1 %v957_v44 }
  0x3b   :  { %848 = vmatpush3.bf16.msra.mxu0 %v941_v59 }
  0x3c   :  { %849 = vmatprep.subr.bf16.mxu0 %v942_v60 }
  0x3d   :  { %883 = vmatpush3.bf16.msra.mxu1 %v949_v4 }
  0x3e   :  { %884 = vmatprep.subr.bf16.mxu1 %v957_v44 }
  0x3f   :  { %850 = vmatpush3.bf16.msra.mxu0 %v943_v61 }
  0x41   :  { %885 = vmatpush3.bf16.msra.mxu1 %v950_v5 }
  0x42   :  { %551 = vmatmul.mubr.bf16.vlgmr.msra.gmra.mrb[4].mxu0 %v32_v63  ;;  %886 = vmatprep.subr.bf16.mxu1 %v957_v44 }
  0x45   :  { %887 = vmatpush3.bf16.msra.mxu1 %v951_v6 }
  0x46   :  { %888 = vmatprep.subr.bf16.mxu1 %v957_v44 }
  0x49   :  { %889 = vmatpush3.bf16.msra.mxu1 %v952_v7 }
  0xf5   :  { %v807_v8 = vpop.f32.mrb[0].mxu0 }
  0xf6   :  { %v808_v10 = vpop.f32.mrb[1].mxu0 }
  0xf7   :  { %v809_v11 = vadd.f32 %v808_v10, %v807_v8  ;;  %v810_v12 = vpop.f32.mrb[2].mxu0  ;;  %v829_v13 = vpop.f32.mrb[0].mxu1 }
  0xf8   :  { %v811_v14 = vpop.f32.mrb[3].mxu0  ;;  %v830_v16 = vpop.f32.mrb[1].mxu1 }
  0xf9   :  { %v473_v15 = vadd.f32 %v809_v11, %v731_v9  ;;  %v831_v17 = vadd.f32 %v830_v16, %v829_v13  ;;  %v832_v18 = vpop.f32.mrb[2].mxu1 }
  0xfa   :  { %v833_v19 = vpop.f32.mrb[3].mxu1 }
  0xfb   :  { %v513_v20 = vadd.f32 %v831_v17, %v473_v15 }
  0xff   :  { %v592_v21 = vpop.f32.mrb[4].mxu1 }
 0x100   :  { %v872_v22 = vpop.f32.mrb[5].mxu1 }
 0x101   :  { %v595_v23 = vpop.f32.mrb[6].mxu1 }
 0x102   :  { %v873_v24 = vpop.f32.mrb[7].mxu1 }
 0x115   :  { %v851_v25 = vpop.f32.mrb[4].mxu0 }
 0x116   :  { %v852_v26 = vpop.f32.mrb[5].mxu0 }
 0x117   :  { %v853_v27 = vadd.f32 %v852_v26, %v851_v25  ;;  %v854_v28 = vpop.f32.mrb[6].mxu0 }
 0x118   :  { %v855_v29 = vpop.f32.mrb[7].mxu0 }
 0x119   :  { %v553_v30 = vadd.f32 %v853_v27, %v513_v20 }
 0x11b   :  { %v593_v31 = vadd.f32 %v592_v21, %v553_v30 }
 0x11d   :  { %v598_v32 = vmax.f32 %v593_v31, 0.0 }
 0x11f   :  { %v599_v33 = vpack.c.bf16 %v598_v32, %v598_v32 }
 0x121   :  { %891 = vmatmul.mubr.bf16.vlgmr.msra.gmra.mrb[8].mxu1 %v599_v33 }
 0x1f4   :  { %v705_v37 = vpop.f32.mrb[8].mxu1 }
 0x1f5   :  { %v706_v38 = vadd.f32 %v782_v36, %v705_v37  ;;  %v892_v39 = vpop.f32.mrb[9].mxu1 }
 0x1f6   :  { %v708_v40 = vpop.f32.mrb[10].mxu1 }
 0x1f7   :  { %v893_v41 = vpop.f32.mrb[11].mxu1  ;;  %v714_v42 = vsel %vm713_vm2, %v706_v38, -1e+30 }
 0x1f8   :  { %715 = vmax.xlane.f32.xlu0 %v714_v42 }
 0x285   :  { %v716_v43 = vpop.xlane.xlu0 %715 }
 0x286   :  { %v717_v44 = vsub.f32 %v714_v42, %v716_v43 }
 0x288   :  { %v718_v45 = vmul.f32 1.442695, %v717_v44 }
 0x28a   :  { %953 = vpow2.f32 %v718_v45 }
 0x294   :  { %v954_v46 = vpop.eup %953 }
 0x295   :  { %720 = vadd.xlane.f32.xlu0 %v954_v46 }
 0x322   :  { %v721_v47 = vpop.xlane.xlu0 %720 }
 0x323   :  { %955 = vlog2.f32 %v721_v47 }
 0x32d   :  { %v956_v48 = vpop.eup %955 }
 0x32e   :  { %v723_v49 = vmul.f32 0.6931472, %v956_v48 }
 0x330   :  { %v724_v50 = vsub.f32 %v717_v44, %v723_v49 }
 0x332   :  { %v725_v51 = vpack.c.bf16 %v724_v50, %v724_v50 }
 0x334   :  { %726 = vst [vmem:[%s1208_s5] sm:$0xf] %v725_v51 }

</bundles_post_ra>
